<compile_context>
chip_gen: v7x
topology: tpu7x:2x2x1
jax: 0.10.0
libtpu: 0.0.40
codegen_flags: <defaults>
</compile_context>

<pallas_src>
import functools

import numpy as np
import jax
import jax.numpy as jnp
from jax.experimental import pallas as pl
from jax.experimental.pallas import tpu as pltpu


def _round_up(x, m):
    return (x + m - 1) // m * m


def _largest_aligned_divisor(total, cap, align=128):
    """Largest multiple of `align` that divides `total` (a multiple of align) and is <= cap."""
    best = align
    d = align
    while d <= min(total, cap):
        if total % d == 0:
            best = d
        d += align
    return best


def _vmem_capacity_bytes():
    """Per-core VMEM capacity; conservative fallback if the query is unavailable."""
    try:
        cap = getattr(pltpu.get_tpu_info(), "vmem_capacity_bytes", None)
        if cap:
            return int(cap)
    except Exception:
        pass
    return 64 << 20  # v7x per-TensorCore VMEM: safe lower bound for all generations.


def _make_kernel(*, cache_lhs: bool, single_k: bool):
    """Fused Linear(+folded BN) -> ReLU kernel variants.

    cache_lhs : bf16-cast the x tile once per batch tile (j == 0) into VMEM scratch and
                reuse it for every N tile (implies single_k).
    single_k  : in_dim fits in one K block -> no accumulator, direct epilogue.
    """

    def kernel(x_ref, wf_ref, shift_ref, o_ref, *scratch):
        idx = 0
        xbf_ref = None
        acc_ref = None
        if cache_lhs:
            xbf_ref = scratch[idx]
            idx += 1
        if not single_k:
            acc_ref = scratch[idx]
            idx += 1

        j = pl.program_id(1)   # out_dim tile
        k = pl.program_id(2)   # in_dim tile

        if cache_lhs:
            # Cast the LHS to bf16 once per batch tile; all N tiles reuse the cache.
            @pl.when(j == 0)
            def _():
                xbf_ref[...] = x_ref[...].astype(jnp.bfloat16)

            lhs = xbf_ref[...]
        else:
            lhs = x_ref[...].astype(jnp.bfloat16)

        part = jnp.dot(lhs, wf_ref[...], preferred_element_type=jnp.float32)

        if single_k:
            # Folded Linear bias + BN shift, ReLU (Dropout eval == identity).
            o_ref[...] = jnp.maximum(part + shift_ref[...], 0.0).astype(o_ref.dtype)
        else:
            @pl.when(k == 0)
            def _():
                acc_ref[...] = jnp.zeros_like(acc_ref)

            acc_ref[...] += part

            @pl.when(k == pl.num_programs(2) - 1)
            def _():
                o_ref[...] = jnp.maximum(acc_ref[...] + shift_ref[...], 0.0).astype(o_ref.dtype)

    return kernel


def prepare_params(w, b, gamma, beta, running_mean, running_var, eps=1e-5):
    """One-time parameter preparation (outside the per-call hot path).

    Folds BatchNorm1d (eval) into the Linear weight/bias, transposes the weight to
    (inDim, outDim), casts it to bf16, and zero-pads outDim to a multiple of 128.
    Returns (wf_bf16 [K, n_pad], shift_f32 [1, n_pad], out_dim).
    """
    out_dim, in_dim = w.shape
    inv_std = 1.0 / jnp.sqrt(running_var + eps)
    scale = gamma * inv_std                               # (outDim,)
    shift = b * scale + beta - running_mean * scale       # (outDim,)  bias + BN folded

    n_pad = _round_up(out_dim, 128)
    wf = (jnp.transpose(w) * scale[None, :]).astype(jnp.bfloat16)   # (K, outDim)
    wf = jnp.pad(wf, ((0, 0), (0, n_pad - out_dim)))
    shift = jnp.pad(shift.astype(jnp.float32), (0, n_pad - out_dim)).reshape(1, n_pad)
    return wf, shift, out_dim


@functools.partial(jax.jit, static_argnames=("out_dim", "tile_b", "max_tile_k", "out_dtype"))
def basic_module_forward(x, wf, shift, *, out_dim, tile_b=None, max_tile_k=1024, out_dtype=None):
    """x: (B, inDim) f32/bf16; wf: (inDim, n_pad) bf16; shift: (1, n_pad) f32."""
    B, in_dim = x.shape
    k_dim, n_pad = wf.shape
    assert k_dim == in_dim and n_pad % 128 == 0 and out_dim <= n_pad
    out_dtype = np.dtype(out_dtype) if out_dtype is not None else x.dtype

    cap = _vmem_capacity_bytes()

    # ---- N tiling: largest 128-aligned tile <= 512 that divides n_pad (no waste). ----
    tile_n = _largest_aligned_divisor(n_pad, 512)
    grid_n = n_pad // tile_n

    # ---- K tiling: only for large, 128-aligned in_dim (v7x 64 MiB VMEM safety). -------
    # TODO(synk): for large non-128-aligned in_dim, pad K once upstream (producer emits
    # K-padded activations) instead of per-call padding here.
    if in_dim % 128 == 0 and in_dim > max_tile_k:
        tile_k = _largest_aligned_divisor(in_dim, max_tile_k)
    else:
        tile_k = in_dim
    grid_k = max(1, in_dim // tile_k)

    single_k = grid_k == 1
    cache_lhs = single_k and grid_n > 1 and x.dtype != np.dtype(jnp.bfloat16)

    # ---- Batch tiling: generation-aware default, shrunk to fit the VMEM budget. -------
    x_bytes = np.dtype(x.dtype).itemsize
    o_bytes = np.dtype(out_dtype).itemsize
    if tile_b is None:
        tile_b = 512 if cap >= (100 << 20) else 256   # bigger tiles on 128-MiB chips
    tile_b = max(8, min(_round_up(B, 8), _round_up(tile_b, 8)))

    def vmem_est(tb):
        w_bufs = 3 if (tb <= 64 and grid_n * grid_k > 2) else 2
        est = 2 * tb * tile_k * x_bytes          # x blocks (double-buffered)
        est += w_bufs * tile_k * tile_n * 2      # weight blocks (bf16)
        est += 2 * 8 * tile_n * 4                # shift blocks (sublane-padded)
        est += 2 * tb * tile_n * o_bytes         # output blocks
        if cache_lhs:
            est += tb * in_dim * 2               # bf16 LHS cache
        if not single_k:
            est += tb * tile_n * 4               # f32 accumulator
        return est

    budget = int(cap * 0.55)
    while vmem_est(tile_b) > budget and tile_b > 8:
        tile_b = max(8, (tile_b // 2 + 7) // 8 * 8)

    grid_b = pl.cdiv(B, tile_b)                  # partial last block: masked stores, no pad
    grid = (grid_b, grid_n, grid_k)

    # Decode / small-batch regime: deep-buffer the weight stream.
    w_spec = pl.BlockSpec((tile_k, tile_n), lambda i, j, k: (k, j))
    if tile_b <= 64 and grid_n * grid_k > 2:
        try:
            w_spec = pl.BlockSpec((tile_k, tile_n), lambda i, j, k: (k, j),
                                  pipeline_mode=pl.Buffered(3))
        except TypeError:
            pass  # fall back to default double-buffering

    scratch_shapes = []
    if cache_lhs:
        scratch_shapes.append(pltpu.VMEM((tile_b, in_dim), jnp.bfloat16))
    if not single_k:
        scratch_shapes.append(pltpu.VMEM((tile_b, tile_n), jnp.float32))

    kernel = _make_kernel(cache_lhs=cache_lhs, single_k=single_k)

    return pl.pallas_call(
        kernel,
        out_shape=jax.ShapeDtypeStruct((B, out_dim), out_dtype),
        grid_spec=pltpu.PrefetchScalarGridSpec(
            num_scalar_prefetch=0,
            grid=grid,
            in_specs=[
                pl.BlockSpec((tile_b, tile_k), lambda i, j, k: (i, k)),   # x tile
                w_spec,                                                   # folded weight
                pl.BlockSpec((1, tile_n), lambda i, j, k: (0, j)),        # folded shift
            ],
            out_specs=pl.BlockSpec((tile_b, tile_n), lambda i, j, k: (i, j)),
            scratch_shapes=scratch_shapes,
        ),
        compiler_params=pltpu.CompilerParams(
            dimension_semantics=("parallel",
                                 "arbitrary" if cache_lhs else "parallel",
                                 "arbitrary"),
            vmem_limit_bytes=int(cap * 3 // 4)),
    )(x, wf, shift)


# ----------------------------- test harness -----------------------------

def _init_params(key, in_dim, out_dim):
    kw, kb, kg, kbeta, km, kv = jax.random.split(key, 6)
    bound = 1.0 / jnp.sqrt(jnp.float32(in_dim))
    w = jax.random.uniform(kw, (out_dim, in_dim), jnp.float32, -bound, bound)
    b = jax.random.uniform(kb, (out_dim,), jnp.float32, -bound, bound)
    gamma = 1.0 + 0.1 * jax.random.normal(kg, (out_dim,), jnp.float32)
    beta = 0.1 * jax.random.normal(kbeta, (out_dim,), jnp.float32)
    rmean = 0.1 * jax.random.normal(km, (out_dim,), jnp.float32)
    rvar = jnp.abs(1.0 + 0.1 * jax.random.normal(kv, (out_dim,), jnp.float32))
    return w, b, gamma, beta, rmean, rvar


def _run_case(key, B, in_dim, out_dim, **fwd_kwargs):
    kp, kx = jax.random.split(key)
    w, b, gamma, beta, rmean, rvar = _init_params(kp, in_dim, out_dim)
    x = jax.random.normal(kx, (B, in_dim), jnp.float32)

    wf, shift, out_dim = prepare_params(w, b, gamma, beta, rmean, rvar)
    out = jax.block_until_ready(
        basic_module_forward(x, wf, shift, out_dim=out_dim, **fwd_kwargs))
    assert out.shape == (B, out_dim)

    # Reference 1: bf16-emulated (same numerics as the kernel).
    ref_bf16 = jnp.maximum(
        jnp.dot(x.astype(jnp.bfloat16), wf[:, :out_dim],
                preferred_element_type=jnp.float32) + shift[:, :out_dim], 0.0)
    # Reference 2: full-precision PyTorch eval semantics (Linear -> BN eval -> ReLU -> Dropout id).
    inv_std = 1.0 / jnp.sqrt(rvar + 1e-5)
    ref_f32 = jnp.maximum((x @ w.T + b - rmean) * inv_std * gamma + beta, 0.0)

    assert jnp.allclose(out, ref_bf16, atol=2e-3, rtol=2e-3), \
        ("bf16 ref mismatch", float(jnp.max(jnp.abs(out - ref_bf16))))
    assert jnp.allclose(out, ref_f32, atol=4e-2, rtol=4e-2), \
        ("f32 ref mismatch", float(jnp.max(jnp.abs(out - ref_f32))))


if __name__ == "__main__":
    root = jax.random.PRNGKey(0)
    k1, k2, k3 = jax.random.split(root, 3)

    # Case 1: small demo shape -> single tile, direct-epilogue path.
    _run_case(k1, B=8, in_dim=32, out_dim=128)
    # Case 2: partial batch tile + K-tiled accumulator path + Buffered(3) weight stream.
    _run_case(k2, B=300, in_dim=256, out_dim=640, tile_b=64, max_tile_k=128)
    # Case 3: bf16 LHS cache reused across multiple N tiles (j-arbitrary path).
    _run_case(k3, B=128, in_dim=256, out_dim=640)

    print("KERNEL_OK")
</pallas_src>

<mosaic_0001>
module attributes {stable_mosaic.version = 11 : i64} {
  func.func @kernel(%arg0: i32, %arg1: i32, %arg2: i32, %arg3: memref<8x32xf32, #tpu.memory_space<vmem>>, %arg4: memref<32x128xbf16, #tpu.memory_space<vmem>>, %arg5: memref<1x128xf32, #tpu.memory_space<vmem>>, %arg6: memref<8x128xf32, #tpu.memory_space<vmem>>) attributes {dimension_semantics = [#tpu.dimension_semantics<parallel>, #tpu.dimension_semantics<parallel>, #tpu.dimension_semantics<arbitrary>], iteration_bounds = array<i64: 1, 1, 1>, scalar_prefetch = 0 : i64, scratch_operands = 0 : i64, tpu.core_type = #tpu.core_type<tc>, window_params = [{transform_indices = @transform_0, window_bounds = array<i64: 8, 32>}, {transform_indices = @transform_1, window_bounds = array<i64: 32, 128>}, {transform_indices = @transform_2, window_bounds = array<i64: 1, 128>}, {transform_indices = @transform_3, window_bounds = array<i64: 8, 128>}]} {
    %c0 = arith.constant 0 : index
    %c0_0 = arith.constant 0 : index
    %0 = vector.load %arg3[%c0, %c0_0] : memref<8x32xf32, #tpu.memory_space<vmem>>, vector<8x32xf32>
    %1 = arith.truncf %0 : vector<8x32xf32> to vector<8x32xbf16>
    %c0_1 = arith.constant 0 : index
    %c0_2 = arith.constant 0 : index
    %2 = vector.load %arg4[%c0_1, %c0_2] : memref<32x128xbf16, #tpu.memory_space<vmem>>, vector<32x128xbf16>
    %cst = arith.constant dense<0.000000e+00> : vector<8x128xf32>
    %3 = tpu.matmul %1, %2, %cst {dimension_numbers = #tpu.dot_dimension_numbers<[1], [0], [0], [1], [0, 0, 1, 1], [], []>} : vector<8x32xbf16>, vector<32x128xbf16>, vector<8x128xf32> -> vector<8x128xf32>
    %c0_3 = arith.constant 0 : index
    %c0_4 = arith.constant 0 : index
    %4 = vector.load %arg5[%c0_3, %c0_4] : memref<1x128xf32, #tpu.memory_space<vmem>>, vector<1x128xf32>
    %5 = vector.broadcast %4 : vector<1x128xf32> to vector<8x128xf32>
    %6 = arith.addf %3, %5 : vector<8x128xf32>
    %cst_5 = arith.constant 0.000000e+00 : f32
    %7 = vector.broadcast %cst_5 : f32 to vector<8x128xf32>
    %8 = arith.maximumf %6, %7 : vector<8x128xf32>
    %c0_6 = arith.constant 0 : index
    %c0_7 = arith.constant 0 : index
    %9 = vector.load %arg6[%c0_6, %c0_7] : memref<8x128xf32, #tpu.memory_space<vmem>>, vector<8x128xf32>
    tpu.vector_store %arg6[%c0_6, %c0_7], %8 {strides = array<i32>} : memref<8x128xf32, #tpu.memory_space<vmem>>, vector<8x128xf32>,
    return
  }
  func.func @transform_0(%arg0: i32, %arg1: i32, %arg2: i32) -> (i32, i32) {
    %c0_i32 = arith.constant 0 : i32
    return %arg0, %arg2 : i32, i32
  }
  func.func @transform_1(%arg0: i32, %arg1: i32, %arg2: i32) -> (i32, i32) {
    %c0_i32 = arith.constant 0 : i32
    return %arg2, %arg1 : i32, i32
  }
  func.func @transform_2(%arg0: i32, %arg1: i32, %arg2: i32) -> (i32, i32) {
    %c0_i32 = arith.constant 0 : i32
    %c0_i32_0 = arith.constant 0 : i32
    return %c0_i32, %arg1 : i32, i32
  }
  func.func @transform_3(%arg0: i32, %arg1: i32, %arg2: i32) -> (i32, i32) {
    %c0_i32 = arith.constant 0 : i32
    return %arg0, %arg1 : i32, i32
  }
}

</mosaic_0001>

<bundles_post_ra>
// kernel: basic_module_forward.1
= control target key start
LH: loop header
LB: loop body
LE: loop exit
PB: predicated region body
PF: predicated region fallthrough
CT: control target
= control target key end

     0   :  { %8 = vsyncpa [#allocation3], 0  ;;  %s298_s0 = inlined_call_operand.hbm [shape: f32[8,32], index: 0, kind: input, shape index: {}]   ;;  %s299_s1 = inlined_call_operand.hbm [shape: bf16[32,128], index: 1, kind: input, shape index: {}]   ;;  %s300_s2 = inlined_call_operand.vmem [shape: f32[1,128], index: 2, kind: input, shape index: {}]   ;;  %s301_s3 = inlined_call_operand.hbm [shape: f32[8,128], index: 3, kind: output, shape index: {}]  }
   0x1   :  { %9 = vsyncpa [#allocation6], 0 }
   0x2   :  { %10 = vsyncpa [#allocation4], 0  ;;  %s225_s12 = smov [#allocation2]   ;;  %s226_s14 = smov [#allocation5]  }
   0x3   :  { %s17_s13 = sshll.u32 %s225_s12, 4  ;;  %s26_s15 = sshll.u32 %s226_s14, 4  ;;  %s18_s13 = int_to_ptr.vmem [resolvable:$true] %s17_s13  ;;  %s252_s15 = int_to_ptr.vmem [resolvable:$true] %s26_s15 }
   0x4   :  { %s153_s18 = scalar_lea.hbm %s298_s0, 128 }
   0x5   :  { %p154_p0 = scmp.ne.s32.totalorder %s298_s0, %s153_s18  ;;  %p157_p1 = scmp.lt.u32.totalorder %s153_s18, %s298_s0 }
   0x7   :  { %p159_p2 = pnand %p157_p1, %p154_p0 }
   0x9   :  { %162 = shalt.err (!%p159_p2)
}
   0xa   :  { %s163_s23 = scalar_lea.vmem %s18_s13, 128  ;;  %p168_p4 = scmp.lt.s32.totalorder %s18_s13, %s18_s13 }
   0xb   :  { %p164_p3 = scmp.ne.s32.totalorder %s18_s13, %s163_s23  ;;  %p169_p5 = scmp.lt.s32.totalorder %s163_s23, %s163_s23 }
   0xd   :  { %p170_p6 = por %p169_p5, %p168_p4 }
   0xf   :  { %p171_p7 = pnand %p170_p6, %p164_p3 }
  0x11   :  { %174 = shalt.err (!%p171_p7)
}
  0x12   :  { %20 = dma.hbm_to_vmem [thread:$0]  %s298_s0, 128, %s18_s13, [#allocation3]  }
  0x13   :  { %s175_s28 = scalar_lea.hbm %s299_s1, 256 }
  0x14   :  { %p176_p8 = scmp.ne.s32.totalorder %s299_s1, %s175_s28  ;;  %p179_p9 = scmp.lt.u32.totalorder %s175_s28, %s299_s1 }
  0x16   :  { %p181_p10 = pnand %p179_p9, %p176_p8 }
  0x18   :  { %184 = shalt.err (!%p181_p10)
}
  0x19   :  { %s185_s6 = scalar_lea.vmem %s252_s15, 256  ;;  %p190_p12 = scmp.lt.s32.totalorder %s252_s15, %s252_s15 }
  0x1a   :  { %p186_p11 = scmp.ne.s32.totalorder %s252_s15, %s185_s6  ;;  %p191_p13 = scmp.lt.s32.totalorder %s185_s6, %s185_s6 }
  0x1c   :  { %p192_p0 = por %p191_p13, %p190_p12 }
  0x1e   :  { %p193_p1 = pnand %p192_p0, %p186_p11 }
  0x20   :  { %196 = shalt.err (!%p193_p1)
}
  0x21   :  { %s227_s0 = smov 64   ;;  %s228_s7 = smov 4  }
  0x22   :  { %32 = dma.hbm_to_vmem [thread:$0]  %s299_s1, 256, %s252_s15, [#allocation6], %s227_s0, %s227_s0, %s228_s7  }
  0x23   :  { %219 = dma.done.wait [#allocation3], 128  }
  0x24   :  { %220 = vsyncadd [#allocation3], 4294967168 }
  0x25   :  { %221 = dma.done.wait [#allocation6], 256  }
  0x26   :  { %222 = vsyncadd [#allocation6], 4294967040  ;;  %v229_v0 = vmov 0.0   ;;  %vm230_vm0 = vmmov 0   ;;  %v151_v1 = vld [vmem:[#allocation5] sm:$0xff]   ;;  %v152_v2 = vld [vmem:[#allocation5 + $0x8] sm:$0xff]  }
  0x27   :  { %136 = vmatprep.subr.bf16.mxu0 %v229_v0  ;;  %140 = vmatprep.mubr.msk.bf16.mxu0 %vm230_vm0, %v229_v0  ;;  %v42_v3 = vld [vmem:[#allocation2] sm:$0xff]  ;;  %vm67_vm1 = vcmask 261120   ;;  %s231_s1 = smov [#allocation7]  }
  0x28   :  { %137 = vmatpush3.bf16.msra.mxu0 %v151_v1  ;;  %v43_v4 = vpack.c.bf16 %v42_v3, %v42_v3  ;;  %v129_v5 = vld [vmem:[%s300_s2] ss:$0 sm:$0xff]  ;;  %s119_s12 = sshll.u32 %s231_s1, 4  ;;  %s120_s12 = int_to_ptr.vmem [resolvable:$true] %s119_s12 }
  0x29   :  { %138 = vmatprep.subr.bf16.mxu0 %v229_v0  ;;  %s197_s13 = scalar_lea.vmem %s120_s12, 128  ;;  %p202_p3 = scmp.lt.s32.totalorder %s120_s12, %s120_s12 }
  0x2a   :  { %p198_p2 = scmp.ne.s32.totalorder %s120_s12, %s197_s13  ;;  %p203_p4 = scmp.lt.s32.totalorder %s197_s13, %s197_s13 }
  0x2c   :  { %139 = vmatpush3.bf16.msra.mxu0 %v152_v2  ;;  %p204_p5 = por %p203_p4, %p202_p3 }
  0x2e   :  { %p205_p6 = pnand %p204_p5, %p198_p2 }
  0x2f   :  { %141 = vmatmul.mubr.msk.bf16.vlgmr.msra.gmra.mrb[0].mxu0 %vm67_vm1, %v43_v4 }
 0x102   :  { %v105_v6 = vpop.f32.mrb[0].mxu0 }
 0x103   :  { %v106_v7 = vadd.f32 %v129_v5, %v105_v6  ;;  %v142_v8 = vpop.f32.mrb[1].mxu0 }
 0x104   :  { %v108_v9 = vpop.f32.mrb[2].mxu0 }
 0x105   :  { %v111_v10 = vmax.f32 %v106_v7, 0.0  ;;  %v143_v11 = vpop.f32.mrb[3].mxu0 }
 0x107   :  { %112 = vst [vmem:[#allocation7] sm:$0xff] %v111_v10 }
 0x108   :  { %208 = shalt.err (!%p205_p6)
}
 0x109   :  { %s209_s2 = scalar_lea.hbm %s301_s3, 128 }
 0x10a   :  { %p210_p7 = scmp.ne.s32.totalorder %s301_s3, %s209_s2  ;;  %p213_p8 = scmp.lt.u32.totalorder %s209_s2, %s301_s3 }
 0x10c   :  { %p215_p9 = pnand %p213_p8, %p210_p7 }
 0x10e   :  { %218 = shalt.err (!%p215_p9)
}
 0x10f   :  { %122 = dma.vmem_to_hbm [thread:$0]  %s120_s12, 128, %s301_s3, [#allocation4]  }
 0x110   :  { %223 = dma.done.wait [#allocation4], 128  }
 0x111   :  { %224 = vsyncadd [#allocation4], 4294967168 }
 0x112   :  { %126 = vsyncpa [#allocation3], 1 }
 0x113   :  { %127 = vsyncpa [#allocation6], 1 }
 0x114   :  { %128 = vsyncpa [#allocation4], 1 }

</bundles_post_ra>
